<compile_context>
chip_gen: v5e
topology: v5e:2x2
jax: 0.10.0
libtpu: 0.0.40
codegen_flags: <defaults>
</compile_context>

<pallas_src>
import functools

import jax
import jax.numpy as jnp
from jax.experimental import pallas as pl
from jax.experimental.pallas import tpu as pltpu


def _ict_kernel(lhs_ref,     # VMEM: (3B, K_pad)  bf16  [ (s*R) (x) w | T ]
                modes_ref,   # VMEM: (K_pad, TV)  bf16  [ dim-major modes | ones ]
                out_ref):    # VMEM: (3B, TV)     f32
    # One MXU contraction per vertex tile does blendshapes + rotation + T.
    out_ref[...] = jnp.dot(lhs_ref[...], modes_ref[...],
                           preferred_element_type=jnp.float32)


def _choose_tv(V, tv_max=2048, min_grid_steps=8):
    """Vertex tile: multiple of 128, <= tv_max, keep the grid long enough
    that v7x can shard it across both TensorCores."""
    v128 = pl.cdiv(V, 128) * 128
    tv = max(128, (min(tv_max, v128) // 128) * 128)
    while tv > 128 and pl.cdiv(v128, tv) < min_grid_steps:
        tv = max(128, ((tv // 2) // 128) * 128)
    return tv


def prepare_ict_model(neutral_mesh, expression_modes, identity_modes, R, s, T,
                      *, tv_max=2048, mode_dtype=jnp.bfloat16):
    """One-time (model-load-time) preprocessing.  NOT in the forward hot path:
    flattens the constant mode buffers to dim-major rows, folds the neutral
    mesh in as an extra mode, appends an all-ones row (carries T), pads V and
    the contraction dim, quantizes to bf16 and folds s into R."""
    Ne, V, _ = expression_modes.shape
    Ni = identity_modes.shape[0]
    Nt = Ne + Ni + 1                       # [expr | id | neutral]
    K = 3 * Nt + 1                         # 3 coords * modes + ones-row (for T)
    K_pad = pl.cdiv(K, 8) * 8
    tv = _choose_tv(V, tv_max)
    V_pad = pl.cdiv(V, tv) * tv

    modes = jnp.concatenate(
        [expression_modes, identity_modes, neutral_mesh[None]], axis=0)   # (Nt, V, 3)
    modes = jnp.transpose(modes, (2, 0, 1)).reshape(3 * Nt, V)            # row = d*Nt+n
    modes = jnp.concatenate([modes, jnp.ones((1, V), modes.dtype)], axis=0)  # (K, V)
    modes = jnp.pad(modes, ((0, K_pad - K), (0, V_pad - V)))
    modes = modes.astype(mode_dtype)                                      # bf16 in HBM

    Rs = (jnp.reshape(s.astype(jnp.float32), ())
          * jnp.reshape(R, (3, 3)).astype(jnp.float32))                   # fold scale
    return dict(modes=modes, Rs=Rs,
                T=jnp.reshape(T, (3,)).astype(jnp.float32),
                Ne=int(Ne), Ni=int(Ni), Nt=int(Nt), K=int(K),
                K_pad=int(K_pad), V=int(V), V_pad=int(V_pad), tv=int(tv))


@functools.partial(jax.jit, static_argnums=(0, 1, 2, 3, 4, 5))
def _ict_forward_impl(Nt, K_pad, V, V_pad, tv, to_canonical,
                      modes, Rs, T, expression_weights, identity_weights):
    B = expression_weights.shape[0]
    K = 3 * Nt + 1
    mode_dtype = modes.dtype
    mode_bytes = jnp.dtype(mode_dtype).itemsize

    # ---- tiny wrapper-side LHS build (fused into this jit) ----------------
    # w = [expr | id | 1]; the trailing ones column selects the neutral mode.
    w = jnp.concatenate(
        [expression_weights.astype(jnp.float32),
         identity_weights.astype(jnp.float32),
         jnp.ones((B, 1), jnp.float32)], axis=1)                          # (B, Nt)
    if to_canonical:
        rot = Rs                                                          # (3, 3) = s*R
        tcol = jnp.broadcast_to(T[:, None, None], (3, B, 1))
    else:
        rot = jnp.eye(3, dtype=jnp.float32)
        tcol = jnp.zeros((3, B, 1), jnp.float32)
    core = jnp.einsum('md,bn->mbdn', rot, w).reshape(3, B, 3 * Nt)        # (3, B, 3Nt)
    lhs = jnp.concatenate([core, tcol], axis=-1).reshape(3 * B, K)        # (3B, K)
    lhs = jnp.pad(lhs, ((0, 0), (0, K_pad - K))).astype(mode_dtype)       # (3B, K_pad)

    # ---- Pallas call ------------------------------------------------------
    grid = (V_pad // tv,)
    # VMEM budget: double-buffered modes + output blocks, plus LHS; headroom.
    block_bytes = (2 * (K_pad * tv * mode_bytes)
                   + 2 * (3 * B * tv * 4)
                   + 2 * (3 * B * K_pad * mode_bytes))
    vmem_limit = int(min(max(2 * block_bytes + (8 << 20), 32 << 20), 64 << 20))

    cost = pl.CostEstimate(
        flops=2 * (3 * B) * K_pad * V_pad,
        transcendentals=0,
        bytes_accessed=(K_pad * V_pad * mode_bytes
                        + 3 * B * K_pad * mode_bytes
                        + 3 * B * V_pad * 4),
    )

    out = pl.pallas_call(
        _ict_kernel,
        out_shape=jax.ShapeDtypeStruct((3 * B, V_pad), jnp.float32),
        grid_spec=pltpu.PrefetchScalarGridSpec(
            num_scalar_prefetch=0,
            grid=grid,
            in_specs=[
                pl.BlockSpec((3 * B, K_pad), lambda v: (0, 0)),   # LHS (resident)
                pl.BlockSpec((K_pad, tv), lambda v: (0, v)),      # modes tile
            ],
            out_specs=pl.BlockSpec((3 * B, tv), lambda v: (0, v)),
        ),
        compiler_params=pltpu.CompilerParams(
            dimension_semantics=("parallel",),
            vmem_limit_bytes=vmem_limit),
        cost_estimate=cost,
    )(lhs, modes)

    # (3B, V_pad) -> (3, B, V) -> (B, V, 3), dropping the padded vertex tail.
    return jnp.transpose(out.reshape(3, B, V_pad)[:, :, :V], (1, 2, 0))


def ict_forward(model, expression_weights, identity_weights, to_canonical=True):
    """Pallas implementation of ICTFaceKitTorch.forward.

    expression_weights: (B, Ne) ; identity_weights: (B, Ni)
    Returns (B, V, 3) f32 in the PyTorch convention.
    """
    B = expression_weights.shape[0]
    assert identity_weights.shape[0] == B
    assert expression_weights.ndim == 2 and identity_weights.ndim == 2
    assert expression_weights.shape[1] == model['Ne']
    assert identity_weights.shape[1] == model['Ni']
    return _ict_forward_impl(
        model['Nt'], model['K_pad'], model['V'], model['V_pad'], model['tv'],
        bool(to_canonical),
        model['modes'], model['Rs'], model['T'],
        expression_weights, identity_weights)


if __name__ == "__main__":
    # Small synthetic shapes consistent with the module's forward:
    #   B batches, Ne expressions, Ni identities, V vertices (x,y,z).
    # V intentionally NOT a multiple of 128 to exercise the padding path.
    B, Ne, Ni, V = 2, 8, 16, 500
    jaw_index = 3  # synthetic stand-in for expression_names.index('jawOpen')

    key = jax.random.PRNGKey(0)
    k1, k2, k3, k4, k5 = jax.random.split(key, 5)

    # Deterministic synthetic "model_dict" buffers (no file loading).
    neutral_mesh = jax.random.normal(k1, (V, 3), jnp.float32)
    expression_modes = 0.1 * jax.random.normal(k2, (Ne, V, 3), jnp.float32)
    identity_modes = 0.1 * jax.random.normal(k3, (Ni, V, 3), jnp.float32)

    # Default buffers from the canonical=None branch of __init__,
    # then batched weight inputs for the forward call.
    expr_default = jnp.zeros((1, Ne), jnp.float32).at[0, jaw_index].set(0.75)
    expr_w = jnp.tile(expr_default, (B, 1)) + 0.05 * jax.random.normal(k4, (B, Ne), jnp.float32)
    id_w = 0.05 * jax.random.normal(k5, (B, Ni), jnp.float32)

    # Non-trivial similarity transform (s, R, T) for to_canonical_space.
    ang = jnp.float32(0.3)
    c, sn = jnp.cos(ang), jnp.sin(ang)
    R = jnp.array([[c, -sn, 0.0],
                   [sn,  c, 0.0],
                   [0.0, 0.0, 1.0]], dtype=jnp.float32)
    s = jnp.array([1.2], dtype=jnp.float32)
    T = jnp.array([0.1, -0.2, 0.3], dtype=jnp.float32)

    # Load-time preprocessing (done once, outside the forward hot path).
    model = prepare_ict_model(neutral_mesh, expression_modes, identity_modes, R, s, T)

    out_c = jax.block_until_ready(ict_forward(model, expr_w, id_w, to_canonical=True))
    out_nc = jax.block_until_ready(ict_forward(model, expr_w, id_w, to_canonical=False))

    # Pure-JAX f32 reference.
    ref_nc = (neutral_mesh[None]
              + jnp.einsum('bn,nvd->bvd', expr_w, expression_modes)
              + jnp.einsum('bn,nvd->bvd', id_w, identity_modes))
    ref_c = s * jnp.einsum('bvd,md->bvm', ref_nc, R) + T[None, None]

    assert out_c.shape == (B, V, 3) and out_nc.shape == (B, V, 3)
    # Modes + folded weights are bf16 (HBM-bandwidth optimization) -> compare
    # with a tolerance covering bf16 quantization (~4e-3 relative).
    assert jnp.allclose(out_nc, ref_nc, atol=3e-2, rtol=3e-2)
    assert jnp.allclose(out_c, ref_c, atol=3e-2, rtol=3e-2)

    # TODO(synk): mesh topology helpers (quad->triangle faces, landmark /
    # facial-mask index bookkeeping) are host-side __init__ preprocessing,
    # not part of the forward hot path, and are intentionally not ported.
    print("KERNEL_OK")
</pallas_src>

<mosaic_0001>
module attributes {stable_mosaic.version = 11 : i64} {
  func.func @_ict_kernel(%arg0: i32, %arg1: memref<6x80xbf16, #tpu.memory_space<vmem>>, %arg2: memref<80x128xbf16, #tpu.memory_space<vmem>>, %arg3: memref<6x128xf32, #tpu.memory_space<vmem>>) attributes {dimension_semantics = [#tpu.dimension_semantics<parallel>], iteration_bounds = array<i64: 4>, scalar_prefetch = 0 : i64, scratch_operands = 0 : i64, tpu.core_type = #tpu.core_type<tc>, window_params = [{pipeline_mode = #tpu.pipeline_mode<synchronous>, transform_indices = @transform_0, window_bounds = array<i64: 6, 80>}, {transform_indices = @transform_1, window_bounds = array<i64: 80, 128>}, {transform_indices = @transform_2, window_bounds = array<i64: 6, 128>}]} {
    %c0 = arith.constant 0 : index
    %c0_0 = arith.constant 0 : index
    %0 = vector.load %arg1[%c0, %c0_0] : memref<6x80xbf16, #tpu.memory_space<vmem>>, vector<6x80xbf16>
    %c0_1 = arith.constant 0 : index
    %c0_2 = arith.constant 0 : index
    %1 = vector.load %arg2[%c0_1, %c0_2] : memref<80x128xbf16, #tpu.memory_space<vmem>>, vector<80x128xbf16>
    %cst = arith.constant dense<0.000000e+00> : vector<6x128xf32>
    %2 = tpu.matmul %0, %1, %cst {dimension_numbers = #tpu.dot_dimension_numbers<[1], [0], [0], [1], [0, 0, 1, 1], [], []>} : vector<6x80xbf16>, vector<80x128xbf16>, vector<6x128xf32> -> vector<6x128xf32>
    %c0_3 = arith.constant 0 : index
    %c0_4 = arith.constant 0 : index
    %3 = vector.load %arg3[%c0_3, %c0_4] : memref<6x128xf32, #tpu.memory_space<vmem>>, vector<6x128xf32>
    tpu.vector_store %arg3[%c0_3, %c0_4], %2 {strides = array<i32>} : memref<6x128xf32, #tpu.memory_space<vmem>>, vector<6x128xf32>,
    return
  }
  func.func @transform_0(%arg0: i32) -> (i32, i32) {
    %c0_i32 = arith.constant 0 : i32
    %c0_i32_0 = arith.constant 0 : i32
    %c0_i32_1 = arith.constant 0 : i32
    return %c0_i32, %c0_i32_0 : i32, i32
  }
  func.func @transform_1(%arg0: i32) -> (i32, i32) {
    %c0_i32 = arith.constant 0 : i32
    %c0_i32_0 = arith.constant 0 : i32
    return %c0_i32, %arg0 : i32, i32
  }
  func.func @transform_2(%arg0: i32) -> (i32, i32) {
    %c0_i32 = arith.constant 0 : i32
    %c0_i32_0 = arith.constant 0 : i32
    return %c0_i32, %arg0 : i32, i32
  }
}

</mosaic_0001>

<bundles_post_ra>
// kernel: _ict_forward_impl.1
= control target key start
LH: loop header
LB: loop body
LE: loop exit
PB: predicated region body
PF: predicated region fallthrough
CT: control target
= control target key end

     0   :  { %7 = vsyncpa [#allocation3], 0  ;;  %s537_s0 = inlined_call_operand.vmem [shape: bf16[6,80], index: 0, kind: input, shape index: {}]   ;;  %s538_s1 = inlined_call_operand.hbm [shape: bf16[80,512], index: 1, kind: input, shape index: {}]   ;;  %s539_s2 = inlined_call_operand.vmem [shape: f32[6,512], index: 2, kind: output, shape index: {}]  }
   0x1   :  { %9 = vsyncpa [#allocation3 + $0x1], 0  ;;  %s450_s9 = smov 0   ;;  %s452_s10 = smov 0  }
   0x2   :  { %s454_s11 = smov 0   ;;  %s456_s12 = smov 0  }
   0x3 LB: > { %s469_s13 = sadd.s32 4294967295, %s430_s12   ;;  %s472_s14 = sadd.s32 1, %s430_s12   ;;  %s430_s12 = sphi %s456_s12, %s545_s12   ;;  %s426_s11 = sphi %s454_s11, %s544_s11   ;;  %s422_s10 = sphi %s452_s10, %s543_s10   ;;  %s418_s9 = sphi %s450_s9, %s542_s9  }
   0x4   : > { %s40_s15 = ssub.s32 %s430_s12, %s472_s14  ;;  %s43_s16 = sadd.s32 1, %s426_s11 }
   0x5   : > { %p41_p0 = scmp.eq.s32.totalorder %s40_s15, 0  ;;  %p50_p1 = scmp.ne.s32.totalorder %s426_s11, %s422_s10 }
   0x6   : > { %p51_p2 = scmp.eq.s32.totalorder %s430_s12, 0  ;;  %p56_p3 = scmp.ne.s32.totalorder %s422_s10, %s418_s9 }
   0x7   : > { %s482_s17 = scalar_select %p41_p0, %s426_s11, %s43_s16  }
   0x8   : > { %p52_p4 = por %p51_p2, %p50_p1  ;;  %p57_p5 = scmp.eq.s32.totalorder %s469_s13, 0 }
   0x9   : > { %p330_p6 = scmp.lt.s32.totalorder %s430_s12, 4  ;;  %s109_s19 = sand.u32 1, %s426_s11  }
   0xa   : > { %p486_p7 = por %p57_p5, %p56_p3  ;;  %s322_s20 = smul.u32 40, %s109_s19 }
   0xb   : > { %s291_s21 = sshll.u32 %s430_s12, 2  ;;  %p492_p8 = pnand %p330_p6, %p52_p4 }
   0xc   : > { %s117_s25 = scalar_lea.hbm %s538_s1, %s291_s21  ;;  %s113_s27 = scalar_lea.vmem [#allocation2], %s322_s20 }
   0xd   : > { %s118_s26 = sshll.u32 %s117_s25, 4  ;;  %s120_s28 = sshll.u32 %s113_s27, 4  ;;  %s119_s26 = int_to_ptr.hbm [resolvable:$true] %s118_s26  ;;  %s121_s28 = int_to_ptr.vmem [resolvable:$true] %s120_s28 }
   0xe   : > { %s110_s29 = scalar_lea.sflag [#allocation3], %s109_s19  ;;  %s366_s30 = sshra.s32 %s119_s26, 4  ;;  %s367_s30 = int_to_ptr.hbm [resolvable:$true] %s366_s30 }
   0xf   : > { %s368_s3 = scalar_lea.hbm %s367_s30, 40  ;;  %p370_p10 = pneg %p492_p8 }
  0x10   : > { %p369_p9 = scmp.ne.s32.totalorder %s367_s30, %s368_s3  ;;  %s373_s6 = scalar_lea.hbm %s538_s1, 160 }
  0x11   : > { %p374_p13 = scmp.lt.s32.totalorder %s367_s30, %s538_s1  ;;  %p375_p0 = scmp.lt.s32.totalorder %s373_s6, %s368_s3 }
  0x12   : > { %p371_p11 = pnand %p370_p10, %p369_p9 }
  0x13   : > { %p376_p1 = por %p375_p0, %p374_p13 }
  0x14   : > { %p372_p12 = pneg %p371_p11 }
  0x16   : > { %p377_p2 = pnand %p376_p1, %p372_p12 }
  0x18   : > { %380 = shalt.err (!%p377_p2)
}
  0x19   : > { %s432_s9 = smov 256   ;;  %s433_s15 = smov 64  }
  0x1a   : > { %s434_s16 = smov 4   ;;  %p292_p3 = scmp.ge.s32.totalorder %s430_s12, 1 }
  0x1b   : > { %329 = dma.hbm_to_vmem [thread:$0]  (!%p492_p8), %s119_s26, 640, %s121_s28, %s110_s29, %s432_s9, %s433_s15, %s434_s16  }
  0x1c   : > { %p128_p4 = scmp.lt.s32.totalorder %s430_s12, 5 }
  0x1e   : > { %p129_p5 = pnand %p292_p3, %p128_p4 }
  0x1f   : > { %s134_s19 = sand.u32 (!%p129_p5), 1, %s422_s10  }
  0x20   : > { %132 = sbr.rel (%p129_p5) target bundleno = 192 (0xc0), region = 28  ;;  %s135_s21 = scalar_lea.sflag (!%p129_p5), [#allocation3], %s134_s19 }
  0x21   : > { %s323_s20 = smul.u32 (!%p129_p5), 40, %s134_s19 }
  0x23   : > { %s138_s23 = scalar_lea.vmem (!%p129_p5), [#allocation2], %s323_s20 }
  0x25   : > { %413 = dma.done.wait (%p486_p7), %s135_s21, 640  }
  0x26   : > { %415 = vsyncadd (%p486_p7), %s135_s21, 4294966656  ;;  %v321_v0 = vld [vmem:[%s138_s23 + $0x20] sm:$0xff]  ;;  %v320_v1 = vld [vmem:[%s138_s23 + $0x18] sm:$0xff]  ;;  %vm205_vm0 = vcmask 654336   ;;  %p159_p6 = scmp.lt.s32.totalorder %s469_s13, 3 }
  0x27   : > { %212 = vmatpush.bf16.msra.mxu0 %v321_v0  ;;  %v319_v2 = vld [vmem:[%s138_s23 + $0x10] sm:$0xff]  ;;  %v318_v3 = vld [vmem:[%s138_s23 + $0x8] sm:$0xff]  ;;  %v317_v4 = vld [vmem:[%s138_s23] sm:$0xff] }
  0x28   : > { %v164_v5 = vld [vmem:[%s537_s0] sm:$0x7]  ;;  %s547_s13 = smov (!%p159_p6, %s469_s13), 3 }
  0x29   : > { %s293_s18 = sshll.u32 %s547_s13, 3 }
  0x2a   : > { %s162_s26 = scalar_lea.vmem %s539_s2, %s293_s18 }
  0x2b   : > { %213 = vmatpush.bf16.msra.mxu0 %v320_v1 }
  0x2f   : > { %214 = vmatpush.bf16.msra.mxu0 %v319_v2 }
  0x33   : > { %215 = vmatpush.bf16.msra.mxu0 %v318_v3 }
  0x37   : > { %216 = vmatpush.bf16.msra.mxu0 %v317_v4 }
  0x3a   : > { %314 = vmatmul.msk.bf16.vlgmr.msra.gmra.mxu0 %vm205_vm0, %v164_v5 }
  0xb7   : > { %v218_v6 = vpop.f32.mrf.mxu0 }
  0xb8   : > { %222 = vst [vmem:[%s162_s26] sm:$0x3f] %v218_v6 }
  0xbf   : > { %v220_v7 = vpop.f32.mrf.mxu0 }
  0xc0 PF: > { %p12_p7 = scmp.ge.s32.totalorder %s472_s14, 6   ;;  %s542_s9 = smov %s422_s10 }
  0xc1   : > { %s543_s10 = smov %s426_s11  ;;  %s544_s11 = smov %s482_s17 }
  0xc2   : > { %s545_s12 = smov %s472_s14  ;;  %14 = sbr.rel (!%p12_p7) target bundleno = 3 (0x3), region = 68 }
  0xc7   :  { %242 = vsyncpa [#allocation3], 1 }
  0xc8   :  { %244 = vsyncpa [#allocation3 + $0x1], 1 }

</bundles_post_ra>
